<compile_context>
chip_gen: v6e
topology: v6e:2x2x1
jax: 0.10.0
libtpu: 0.0.40
codegen_flags: <defaults>
</compile_context>

<pallas_src>
import functools

import jax
import jax.numpy as jnp
from jax import lax
from jax.experimental import pallas as pl
from jax.experimental.pallas import tpu as pltpu


def dense_layer_kernel(x_ref, w1_ref, b1_ref, w2t_ref, b2_ref, o_ref, *, chunk):
    # x_ref  : (in_features, TB)      batch-on-lanes tile of x^T
    # w1_ref : (nodes, in_features)   PyTorch linear1.weight layout (resident)
    # b1_ref : (nodes, 1)
    # w2t_ref: (nodes, num_assets)    linear2.weight transposed (resident)
    # b2_ref : (num_assets, 1)
    # o_ref  : (num_assets, TB)       tile of y^T
    in_features, tb = x_ref.shape
    num_assets = o_ref.shape[0]
    n_chunks = tb // chunk

    # Loop-invariant loads + lane-broadcast column slices, hoisted out of the
    # chunk loop (executed once per grid step, amortized by the large tile).
    w1 = w1_ref[...]
    b1 = b1_ref[...]
    w2t = w2t_ref[...]
    b2 = b2_ref[...]
    w1_cols = [w1[:, k:k + 1] for k in range(in_features)]   # (nodes, 1) each
    w2_cols = [w2t[:, a:a + 1] for a in range(num_assets)]   # (nodes, 1) each

    def chunk_body(c, carry):
        off = pl.multiple_of(c * chunk, chunk)     # chunk is a multiple of 128
        x = x_ref[:, pl.ds(off, chunk)]            # (in_features, chunk)

        # ---- linear1 + tanh: VPU broadcast FMAs over the tiny K axis ----
        # h[j, :] = tanh(b1[j] + sum_k w1[j, k] * x[k, :])  (bias folded in)
        acc = w1_cols[0] * x[0:1, :] + b1          # (nodes, chunk)
        for k in range(1, in_features):            # unrolled at trace time (K == 2)
            acc = acc + w1_cols[k] * x[k:k + 1, :]
        h = jnp.tanh(acc)                          # EUP, lane-dense

        # ---- linear2: per-output sublane reduction over the 32 nodes ----
        rows = []
        for a in range(num_assets):                # num_assets == 1 -> single reduce
            ya = jnp.sum(w2_cols[a] * h, axis=0, keepdims=True) + b2[a:a + 1, :]
            rows.append(ya)                        # (1, chunk)
        y = rows[0] if num_assets == 1 else jnp.concatenate(rows, axis=0)

        o_ref[:, pl.ds(off, chunk)] = y.astype(o_ref.dtype)
        return carry

    lax.fori_loop(0, n_chunks, chunk_body, 0, unroll=True)


def dense_layer_forward(x, w1, b1, w2, b2, *, tb=4096, chunk=512, feature_major=False):
    """Forward pass of DenseLayer: y = tanh(x @ w1.T + b1) @ w2.T + b2.

    x : (B, num_assets + 1) float32, or (num_assets + 1, B) if feature_major=True
        (feature-major input skips the wrapper-side HBM transpose entirely).
    w1: (nodes, num_assets + 1)  -- PyTorch linear1.weight
    b1: (nodes,)
    w2: (num_assets, nodes)      -- PyTorch linear2.weight
    b2: (num_assets,)
    returns (B, num_assets) float32.
    """
    if feature_major:
        in_features, B = x.shape
        xT = x
    else:
        B, in_features = x.shape
        xT = x.T
    nodes = w1.shape[0]
    num_assets = w2.shape[0]

    # Lane-dense layout: batch lives on the lane (last) axis. Tile and chunk are
    # multiples of 128; clamp the tile to the 128-padded batch so tiny batches
    # don't pay for a huge padded tile, and make the tile a whole number of chunks.
    tb = max(128, (int(tb) // 128) * 128)
    tb = min(tb, pl.cdiv(B, 128) * 128)
    chunk = max(128, (min(int(chunk), tb) // 128) * 128)
    tb = (tb // chunk) * chunk

    n_tiles = pl.cdiv(B, tb)
    bp = n_tiles * tb

    # Pad only up to the tile multiple (no extra full re-layout beyond x.T above).
    xT = jnp.pad(xT.astype(jnp.float32), ((0, 0), (0, bp - B)))
    w1c = w1.astype(jnp.float32)
    b1c = b1.reshape(nodes, 1).astype(jnp.float32)
    w2t = w2.T.astype(jnp.float32)                 # (nodes, num_assets)
    b2c = b2.reshape(num_assets, 1).astype(jnp.float32)

    # Raise scoped VMEM only when the double-buffered batch tiles actually need it
    # (only very large tb; mostly a v5e concern with its 16 MiB default).
    need_bytes = 2 * (in_features + num_assets) * tb * 4 + (1 << 20)
    compiler_kwargs = dict(dimension_semantics=(pltpu.PARALLEL,))
    if need_bytes > (16 << 20):
        compiler_kwargs["vmem_limit_bytes"] = min(2 * need_bytes, 100 << 20)

    yT = pl.pallas_call(
        functools.partial(dense_layer_kernel, chunk=chunk),
        out_shape=jax.ShapeDtypeStruct((num_assets, bp), jnp.float32),
        grid=(n_tiles,),
        in_specs=[
            pl.BlockSpec((in_features, tb), lambda i: (0, i)),      # batch-tiled x^T
            pl.BlockSpec((nodes, in_features), lambda i: (0, 0)),   # resident weights
            pl.BlockSpec((nodes, 1), lambda i: (0, 0)),
            pl.BlockSpec((nodes, num_assets), lambda i: (0, 0)),
            pl.BlockSpec((num_assets, 1), lambda i: (0, 0)),
        ],
        out_specs=pl.BlockSpec((num_assets, tb), lambda i: (0, i)),
        compiler_params=pltpu.CompilerParams(**compiler_kwargs),
    )(xT, w1c, b1c, w2t, b2c)

    return yT[:, :B].T                             # (B, num_assets)


def init_params(key, num_assets=1, nodes=32):
    """Deterministic init matching PyTorch Linear defaults (uniform +/- 1/sqrt(fan_in)).
    Weights kept in PyTorch layout: (out_features, in_features)."""
    k1, k2, k3, k4 = jax.random.split(key, 4)
    in1 = num_assets + 1
    bound1 = 1.0 / jnp.sqrt(in1)
    bound2 = 1.0 / jnp.sqrt(nodes)
    w1 = jax.random.uniform(k1, (nodes, in1), jnp.float32, -bound1, bound1)
    b1 = jax.random.uniform(k2, (nodes,), jnp.float32, -bound1, bound1)
    w2 = jax.random.uniform(k3, (num_assets, nodes), jnp.float32, -bound2, bound2)
    b2 = jax.random.uniform(k4, (num_assets,), jnp.float32, -bound2, bound2)
    return w1, b1, w2, b2


if __name__ == "__main__":
    num_assets = 1
    nodes = 32

    key = jax.random.PRNGKey(0)
    kx1, kx2, kx3, kp = jax.random.split(key, 4)
    w1, b1, w2, b2 = init_params(kp, num_assets=num_assets, nodes=nodes)

    def reference(x):
        return jnp.tanh(x @ w1.T + b1) @ w2.T + b2

    # tanh lowers to the EUP's approximate transcendental path -> slightly looser tol.
    TOL = 5e-5

    # Case 1: tiny batch (tile clamps to one 128-wide lane tile, single chunk).
    x_small = jax.random.normal(kx1, (8, num_assets + 1), jnp.float32)
    out_small = jax.block_until_ready(dense_layer_forward(x_small, w1, b1, w2, b2))
    assert out_small.shape == (8, num_assets)
    assert jnp.allclose(out_small, reference(x_small), atol=TOL), "mismatch (small batch)"

    # Case 2: multi-tile grid + multi-chunk inner loop with padding.
    x_mid = jax.random.normal(kx2, (1200, num_assets + 1), jnp.float32)
    out_mid = jax.block_until_ready(
        dense_layer_forward(x_mid, w1, b1, w2, b2, tb=512, chunk=256))
    assert out_mid.shape == (1200, num_assets)
    assert jnp.allclose(out_mid, reference(x_mid), atol=TOL), "mismatch (mid batch)"

    # Case 3: default large tile (tb=4096, chunk=512): 2 grid tiles x 8 chunks.
    x_big = jax.random.normal(kx3, (5000, num_assets + 1), jnp.float32)
    out_big = jax.block_until_ready(dense_layer_forward(x_big, w1, b1, w2, b2))
    assert out_big.shape == (5000, num_assets)
    assert jnp.allclose(out_big, reference(x_big), atol=TOL), "mismatch (big batch)"

    # Case 4: feature-major fast path (no wrapper-side transpose of x).
    out_fm = jax.block_until_ready(
        dense_layer_forward(x_big.T, w1, b1, w2, b2, feature_major=True))
    assert jnp.allclose(out_fm, out_big, atol=1e-6), "mismatch (feature-major path)"

    print("KERNEL_OK")
</pallas_src>

<mosaic_0001>
module attributes {stable_mosaic.version = 11 : i64} {
  func.func @dense_layer_kernel(%arg0: i32, %arg1: memref<2x128xf32, #tpu.memory_space<vmem>>, %arg2: memref<32x2xf32, #tpu.memory_space<vmem>>, %arg3: memref<32x1xf32, #tpu.memory_space<vmem>>, %arg4: memref<32x1xf32, #tpu.memory_space<vmem>>, %arg5: memref<1x1xf32, #tpu.memory_space<vmem>>, %arg6: memref<1x128xf32, #tpu.memory_space<vmem>>) attributes {dimension_semantics = [#tpu.dimension_semantics<parallel>], iteration_bounds = array<i64: 1>, scalar_prefetch = 0 : i64, scratch_operands = 0 : i64, tpu.core_type = #tpu.core_type<tc>, window_params = [{transform_indices = @transform_0, window_bounds = array<i64: 2, 128>}, {pipeline_mode = #tpu.pipeline_mode<synchronous>, transform_indices = @transform_1, window_bounds = array<i64: 32, 2>}, {pipeline_mode = #tpu.pipeline_mode<synchronous>, transform_indices = @transform_2, window_bounds = array<i64: 32, 1>}, {pipeline_mode = #tpu.pipeline_mode<synchronous>, transform_indices = @transform_3, window_bounds = array<i64: 32, 1>}, {pipeline_mode = #tpu.pipeline_mode<synchronous>, transform_indices = @transform_4, window_bounds = array<i64: 1, 1>}, {transform_indices = @transform_5, window_bounds = array<i64: 1, 128>}]} {
    %c0 = arith.constant 0 : index
    %c0_0 = arith.constant 0 : index
    %0 = vector.load %arg2[%c0, %c0_0] : memref<32x2xf32, #tpu.memory_space<vmem>>, vector<32x2xf32>
    %c0_1 = arith.constant 0 : index
    %c0_2 = arith.constant 0 : index
    %1 = vector.load %arg3[%c0_1, %c0_2] : memref<32x1xf32, #tpu.memory_space<vmem>>, vector<32x1xf32>
    %c0_3 = arith.constant 0 : index
    %c0_4 = arith.constant 0 : index
    %2 = vector.load %arg4[%c0_3, %c0_4] : memref<32x1xf32, #tpu.memory_space<vmem>>, vector<32x1xf32>
    %c0_5 = arith.constant 0 : index
    %c0_6 = arith.constant 0 : index
    %3 = vector.load %arg5[%c0_5, %c0_6] : memref<1x1xf32, #tpu.memory_space<vmem>>, vector<1x1xf32>
    %4 = vector.extract_strided_slice %0 {offsets = [0, 0], sizes = [32, 1], strides = [1, 1]} : vector<32x2xf32> to vector<32x1xf32>
    %5 = vector.extract_strided_slice %0 {offsets = [0, 1], sizes = [32, 1], strides = [1, 1]} : vector<32x2xf32> to vector<32x1xf32>
    %c0_i32 = arith.constant 0 : i32
    %c128_i32 = arith.constant 128 : i32
    %6 = arith.muli %c0_i32, %c128_i32 : i32
    %7 = tpu.assume_multiple %6, 128 : i32
    %c0_7 = arith.constant 0 : index
    %8 = arith.index_cast %7 : i32 to index
    %9 = vector.load %arg1[%c0_7, %8] : memref<2x128xf32, #tpu.memory_space<vmem>>, vector<2x128xf32>
    %10 = vector.extract_strided_slice %9 {offsets = [0, 0], sizes = [1, 128], strides = [1, 1]} : vector<2x128xf32> to vector<1x128xf32>
    %11 = vector.broadcast %4 : vector<32x1xf32> to vector<32x128xf32>
    %12 = vector.broadcast %10 : vector<1x128xf32> to vector<32x128xf32>
    %13 = arith.mulf %11, %12 : vector<32x128xf32>
    %14 = vector.broadcast %1 : vector<32x1xf32> to vector<32x128xf32>
    %15 = arith.addf %13, %14 : vector<32x128xf32>
    %16 = vector.extract_strided_slice %9 {offsets = [1, 0], sizes = [1, 128], strides = [1, 1]} : vector<2x128xf32> to vector<1x128xf32>
    %17 = vector.broadcast %5 : vector<32x1xf32> to vector<32x128xf32>
    %18 = vector.broadcast %16 : vector<1x128xf32> to vector<32x128xf32>
    %19 = arith.mulf %17, %18 : vector<32x128xf32>
    %20 = arith.addf %15, %19 : vector<32x128xf32>
    %21 = math.tanh %20 : vector<32x128xf32>
    %22 = vector.broadcast %2 : vector<32x1xf32> to vector<32x128xf32>
    %23 = arith.mulf %22, %21 : vector<32x128xf32>
    %cst = arith.constant dense<0.000000e+00> : vector<128xf32>
    %24 = vector.multi_reduction <add>, %23, %cst [0] : vector<32x128xf32> to vector<128xf32>
    %25 = vector.shape_cast %24 : vector<128xf32> to vector<1x128xf32>
    %26 = vector.broadcast %3 : vector<1x1xf32> to vector<1x128xf32>
    %27 = arith.addf %25, %26 : vector<1x128xf32>
    %c0_8 = arith.constant 0 : index
    %28 = arith.index_cast %7 : i32 to index
    %29 = vector.load %arg6[%c0_8, %28] : memref<1x128xf32, #tpu.memory_space<vmem>>, vector<1x128xf32>
    tpu.vector_store %arg6[%c0_8, %28], %27 {strides = array<i32>} : memref<1x128xf32, #tpu.memory_space<vmem>>, vector<1x128xf32>,
    %c1_i32 = arith.constant 1 : i32
    return
  }
  func.func @transform_0(%arg0: i32) -> (i32, i32) {
    %c0_i32 = arith.constant 0 : i32
    %c0_i32_0 = arith.constant 0 : i32
    return %c0_i32, %arg0 : i32, i32
  }
  func.func @transform_1(%arg0: i32) -> (i32, i32) {
    %c0_i32 = arith.constant 0 : i32
    %c0_i32_0 = arith.constant 0 : i32
    %c0_i32_1 = arith.constant 0 : i32
    return %c0_i32, %c0_i32_0 : i32, i32
  }
  func.func @transform_2(%arg0: i32) -> (i32, i32) {
    %c0_i32 = arith.constant 0 : i32
    %c0_i32_0 = arith.constant 0 : i32
    %c0_i32_1 = arith.constant 0 : i32
    return %c0_i32, %c0_i32_0 : i32, i32
  }
  func.func @transform_3(%arg0: i32) -> (i32, i32) {
    %c0_i32 = arith.constant 0 : i32
    %c0_i32_0 = arith.constant 0 : i32
    %c0_i32_1 = arith.constant 0 : i32
    return %c0_i32, %c0_i32_0 : i32, i32
  }
  func.func @transform_4(%arg0: i32) -> (i32, i32) {
    %c0_i32 = arith.constant 0 : i32
    %c0_i32_0 = arith.constant 0 : i32
    %c0_i32_1 = arith.constant 0 : i32
    return %c0_i32, %c0_i32_0 : i32, i32
  }
  func.func @transform_5(%arg0: i32) -> (i32, i32) {
    %c0_i32 = arith.constant 0 : i32
    %c0_i32_0 = arith.constant 0 : i32
    return %c0_i32, %arg0 : i32, i32
  }
}

</mosaic_0001>

<bundles_post_ra>
// kernel: tpu_custom_call.1
= control target key start
LH: loop header
LB: loop body
LE: loop exit
PB: predicated region body
PF: predicated region fallthrough
CT: control target
= control target key end

     0   :  { %s296_s0 = inlined_call_operand.vmem [shape: f32[2,128], index: 0, kind: input, shape index: {}]   ;;  %s297_s1 = inlined_call_operand.vmem [shape: f32[32,2], index: 1, kind: input, shape index: {}]   ;;  %s298_s2 = inlined_call_operand.vmem [shape: f32[32,1], index: 2, kind: input, shape index: {}]   ;;  %s299_s3 = inlined_call_operand.vmem [shape: f32[32,1], index: 3, kind: input, shape index: {}]   ;;  %s300_s4 = inlined_call_operand.<no memory space> [shape: f32[1,1], index: 4, kind: input, shape index: {}]   ;;  %s301_s5 = inlined_call_operand.hbm [shape: f32[1,128], index: 5, kind: output, shape index: {}]  }
   0x1   :  { %v10_v0 = vstv %s300_s4 }
   0x2   :  { %11 = vst [vmem:[#allocation2] sm:$0x1] %v10_v0 }
   0x3   :  { %v25_v1 = vld [vmem:[%s297_s1 + $0x10] sm:$0xff]  ;;  %v23_v2 = vld [vmem:[%s297_s1] sm:$0xff]  ;;  %v218_v3 = vmov 0   ;;  %v24_v5 = vld [vmem:[%s297_s1 + $0x8] sm:$0xff] }
   0x4   :  { %183 = vset.pattern.permute.xlu1 %v218_v3  ;;  %182 = vset.pattern.permute.xlu0 %v218_v3  ;;  %v27_v4 = vld [vmem:[%s298_s2] sm:$0xff] }
   0x5   :  { %49 = vperm.xlu1 %183, %v25_v1   ;;  %39 = vperm.xlu0 %182, %v23_v2  }
   0x6   :  { %12 = vsyncpa [#allocation4], 0  ;;  %v28_v6 = vld [vmem:[%s298_s2 + $0x8] sm:$0xff]  ;;  %v219_v7 = vmov 1   ;;  %v26_v8 = vld [vmem:[%s297_s1 + $0x18] sm:$0xff]  ;;  %v57_v16 = vlaneseq }
   0x7   :  { %v29_v9 = vld [vmem:[%s298_s2 + $0x10] sm:$0xff]  ;;  %v30_v10 = vld [vmem:[%s298_s2 + $0x18] sm:$0xff]  ;;  %v31_v11 = vld [vmem:[%s299_s3] sm:$0xff] }
   0x8   :  { %v32_v12 = vld [vmem:[%s299_s3 + $0x8] sm:$0xff]  ;;  %v33_v13 = vld [vmem:[%s299_s3 + $0x10] sm:$0xff]  ;;  %v34_v15 = vld [vmem:[%s299_s3 + $0x18] sm:$0xff]  ;;  %v58_v17 = vshrl.u32 %v57_v16, 7 }
   0x9   :  { %67 = vperm.xlu1 %183, %v27_v4   ;;  %44 = vperm.xlu0 %182, %v24_v5   ;;  %v35_v14 = vld [vmem:[#allocation2] sm:$0x1] }
   0xa   :  { %v59_v20 = vsub.s32 0, %v58_v17  ;;  %v36_v21 = vld [vmem:[%s296_s0] sm:$0x3]  ;;  %v107_v24 = vsub.s32 1, %v58_v17  ;;  %s220_s0 = smov [#allocation3]  }
   0xb   :  { %s171_s3 = sshll.u32 %s220_s0, 4  ;;  %s172_s3 = int_to_ptr.vmem [resolvable:$true] %s171_s3 }
   0xc   :  { %v60_v25 = vrot.slane %v36_v21, %v59_v20  ;;  %v108_v27 = vrot.slane %v36_v21, %v107_v24  ;;  %s196_s18 = scalar_lea.vmem %s172_s3, 16  ;;  %s200_s19 = scalar_lea.vmem %s172_s3, 32 }
   0xd   :  { %184 = vset.pattern.permute.xlu1 %v219_v7  ;;  %72 = vperm.xlu0 %182, %v28_v6   ;;  %p197_p0 = scmp.ne.s32.totalorder %s172_s3, %s196_s18  ;;  %p201_p1 = scmp.lt.s32.totalorder %s172_s3, %s172_s3 }
   0xe   :  { %90 = vperm.xlu1 %184, %v23_v2   ;;  %p202_p2 = scmp.lt.s32.totalorder %s200_s19, %s196_s18 }
  0x10   :  { %p203_p3 = por %p202_p2, %p201_p1 }
  0x11   :  { %185 = vset.pattern.permute.xlu0 %v219_v7 }
  0x12   :  { %186 = vset.pattern.permute.xlu1 %v218_v3  ;;  %94 = vperm.xlu0 %185, %v24_v5   ;;  %p204_p4 = pnand %p203_p3, %p197_p0 }
  0x13   :  { %54 = vperm.xlu1 %186, %v26_v8  }
  0x16   :  { %98 = vperm.xlu0 %185, %v25_v1  }
  0x17   :  { %77 = vperm.xlu1 %186, %v29_v9  }
  0x1a   :  { %102 = vperm.xlu0 %185, %v26_v8  }
  0x1b   :  { %82 = vperm.xlu1 %186, %v30_v10  }
  0x1e   :  { %187 = vset.pattern.permute.xlu0 %v218_v3 }
  0x1f   :  { %123 = vperm.xlu1 %186, %v31_v11   ;;  %128 = vperm.xlu0 %187, %v32_v12  }
  0x23   :  { %133 = vperm.xlu1 %186, %v33_v13   ;;  %156 = vperm.xlu0 %187, %v35_v14  }
  0x27   :  { %138 = vperm.xlu1 %186, %v34_v15  }
  0x80   :  { %v50_v18 = vpop.permute.xlu1 %49  ;;  %v40_v19 = vpop.permute.xlu0 %39 }
  0x81   :  { %v61_v29 = vmul.f32 %v60_v25, %v40_v19  ;;  %v63_v38 = vmul.f32 %v60_v25, %v50_v18 }
  0x84   :  { %v68_v22 = vpop.permute.xlu1 %67  ;;  %v45_v23 = vpop.permute.xlu0 %44 }
  0x85   :  { %v62_v30 = vmul.f32 %v60_v25, %v45_v23  ;;  %v85_v36 = vadd.f32 %v68_v22, %v61_v29 }
  0x88   :  { %v73_v26 = vpop.permute.xlu0 %72 }
  0x89   :  { %v91_v28 = vpop.permute.xlu1 %90  ;;  %v86_v33 = vadd.f32 %v73_v26, %v62_v30 }
  0x8a   :  { %v109_v31 = vmul.f32 %v108_v27, %v91_v28 }
  0x8c   :  { %v113_v39 = vadd.f32 %v109_v31, %v85_v36 }
  0x8d   :  { %v95_v32 = vpop.permute.xlu0 %94 }
  0x8e   :  { %v110_v34 = vmul.f32 %v108_v27, %v95_v32  ;;  %v55_v35 = vpop.permute.xlu1 %54 }
  0x8f   :  { %v64_v44 = vmul.f32 %v60_v25, %v55_v35 }
  0x90   :  { %v114_v37 = vadd.f32 %v110_v34, %v86_v33 }
  0x91   :  { %v99_v40 = vpop.permute.xlu0 %98 }
  0x92   :  { %v111_v41 = vmul.f32 %v108_v27, %v99_v40  ;;  %v78_v42 = vpop.permute.xlu1 %77  ;;  %188 = vtanh.f32 %v114_v37 }
  0x93   :  { %v87_v43 = vadd.f32 %v78_v42, %v63_v38  ;;  %190 = vtanh.f32 %v113_v39 }
  0x95   :  { %v115_v45 = vadd.f32 %v111_v41, %v87_v43  ;;  %v103_v46 = vpop.permute.xlu0 %102 }
  0x96   :  { %v112_v47 = vmul.f32 %v108_v27, %v103_v46  ;;  %v83_v48 = vpop.permute.xlu1 %82 }
  0x97   :  { %192 = vtanh.f32 %v115_v45  ;;  %v88_v49 = vadd.f32 %v83_v48, %v64_v44 }
  0x99   :  { %v116_v50 = vadd.f32 %v112_v47, %v88_v49 }
  0x9a   :  { %v124_v51 = vpop.permute.xlu1 %123  ;;  %v129_v53 = vpop.permute.xlu0 %128 }
  0x9b   :  { %194 = vtanh.f32 %v116_v50 }
  0x9e   :  { %v134_v55 = vpop.permute.xlu1 %133  ;;  %v157_v6 = vpop.permute.xlu0 %156 }
  0x9f   :  { %v189_v52 = vpop.eup %188  ;;  %v162_v8 = vrot.slane %v157_v6, %v59_v20 }
  0xa0   :  { %v191_v54 = vpop.eup %190  ;;  %v142_v56 = vmul.f32 %v189_v52, %v129_v53 }
  0xa1   :  { %v141_v58 = vmul.f32 %v191_v54, %v124_v51 }
  0xa2   :  { %v139_v62 = vpop.permute.xlu1 %138 }
  0xa3   :  { %v145_v60 = vadd.f32 %v142_v56, %v141_v58 }
  0xa4   :  { %v193_v57 = vpop.eup %192 }
  0xa5   :  { %v143_v59 = vmul.f32 %v193_v57, %v134_v55 }
  0xa7   :  { %v146_v0 = vadd.f32 %v145_v60, %v143_v59 }
  0xa8   :  { %v195_v61 = vpop.eup %194 }
  0xa9   :  { %v144_v63 = vmul.f32 %v195_v61, %v139_v62 }
  0xab   :  { %v147_v1 = vadd.f32 %v146_v0, %v144_v63 }
  0xad   :  { %v148_v2 = vrot.slane %v147_v1, 4 }
  0xaf   :  { %v149_v3 = vadd.f32 %v148_v2, %v147_v1 }
  0xb1   :  { %v150_v4 = vrot.slane %v149_v3, 2 }
  0xb3   :  { %v151_v5 = vadd.f32 %v150_v4, %v149_v3 }
  0xb5   :  { %v152_v7 = vrot.slane %v151_v5, 1 }
  0xb7   :  { %v153_v9 = vadd.f32 %v152_v7, %v151_v5 }
  0xb9   :  { %v163_v10 = vadd.f32 %v162_v8, %v153_v9 }
  0xbb   :  { %164 = vst [vmem:[#allocation3] sm:$0x1] %v163_v10 }
  0xbc   :  { %207 = shalt.err (!%p204_p4)
}
  0xbd   :  { %174 = dma.vmem_to_hbm [thread:$0]  %s172_s3, 16, %s301_s5, [#allocation4]  }
  0xbe   :  { %216 = dma.done.wait [#allocation4], 16  }
  0xbf   :  { %217 = vsyncadd [#allocation4], 4294967280 }
  0xc0   :  { %178 = vsyncpa [#allocation4], 1 }

</bundles_post_ra>
